<compile_context>
chip_gen: v6e
topology: v6e:2x2x1
jax: 0.10.0
libtpu: 0.0.40
codegen_flags: <defaults>
</compile_context>

<pallas_src>
import functools

import jax
import jax.numpy as jnp
import numpy as np
from jax.experimental import pallas as pl
from jax.experimental.pallas import tpu as pltpu


def fused_ensemble_kernel(x_ref, t_ref, w1x_ref, w1t_ref, b1_ref,
                          w2_ref, b2_ref, o_ref, *, E, H):
    """Whole ensemble in one invocation; all operands VMEM-resident, no grid.

    Layer 1 fuses the ensemble into the MXU lane dimension:
      (B, Dx) @ (Dx, E*H)  +  (B, Dt) @ (Dt, E*H)  + b1  -> relu -> (B, E*H)
    Layer 2 is a static unroll over E per-member (H, C) matmuls, writing the
    stacked (E, B, C) output directly (no wrapper-side transpose needed).
    """
    h = jnp.dot(x_ref[...], w1x_ref[...], preferred_element_type=jnp.float32)
    h = h + jnp.dot(t_ref[...], w1t_ref[...], preferred_element_type=jnp.float32)
    h = jnp.maximum(h + b1_ref[...], 0.0)                     # (B, E*H)

    for e in range(E):                                         # static unroll (E small)
        he = h[:, e * H:(e + 1) * H]                           # (B, H) lane slice
        o_ref[e] = (
            jnp.dot(he, w2_ref[e], preferred_element_type=jnp.float32)
            + b2_ref[e]
        ).astype(o_ref.dtype)


def pack_ensemble_params(params, D_x):
    """One-time packing of per-member weights into kernel-ready layouts.

    Depends only on params (not on x/t) -> call ONCE at init, not per forward.
    """
    w1, b1, w2, b2 = params["w1"], params["b1"], params["w2"], params["b2"]
    E, Din, H = w1.shape
    # (E, Din, H) -> (Din, E*H): ensemble fused into the lane dimension.
    w1_f = jnp.transpose(w1, (1, 0, 2)).reshape(Din, E * H)
    return {
        "w1x": w1_f[:D_x],                 # (D_x, E*H)  rows acting on x
        "w1t": w1_f[D_x:],                 # (D_t, E*H)  rows acting on t
        "b1":  b1.reshape(1, E * H),       # (1, E*H)   same (e,h) ordering as w1_f
        "w2":  w2,                         # (E, H, C)  per-member second layer
        "b2":  b2,                         # (E, 1, C)
    }


@jax.jit
def diffusion_ensemble_forward(x, t, packed):
    """Pallas forward. Returns (logits [E, B, C], None) like the nn.Module."""
    E, H, C = packed["w2"].shape
    B, D_x = x.shape
    D_t = t.shape[1]

    vmem = pl.BlockSpec(memory_space=pltpu.MemorySpace.VMEM)
    flops = 2 * B * (D_x * E * H + D_t * E * H + E * H * C)
    bytes_accessed = 4 * (
        x.size + t.size + sum(int(np.prod(v.shape)) for v in packed.values())
        + E * B * C
    )

    out = pl.pallas_call(
        functools.partial(fused_ensemble_kernel, E=E, H=H),
        out_shape=jax.ShapeDtypeStruct((E, B, C), jnp.float32),
        in_specs=[vmem] * 7,
        out_specs=vmem,
        cost_estimate=pl.CostEstimate(
            flops=flops, transcendentals=0, bytes_accessed=bytes_accessed),
    )(x, t, packed["w1x"], packed["w1t"], packed["b1"],
      packed["w2"], packed["b2"])
    return out, None


def init_ensemble_params(key, E, D_x, D_t, H, C):
    """Deterministic synthetic per-member parameters (stands in for the E models)."""
    Din = D_x + D_t
    k1, k2, k3, k4 = jax.random.split(key, 4)
    return {
        "w1": jax.random.normal(k1, (E, Din, H), jnp.float32) * 0.1,
        "b1": jax.random.normal(k2, (E, 1, H), jnp.float32) * 0.01,
        "w2": jax.random.normal(k3, (E, H, C), jnp.float32) * 0.1,
        "b2": jax.random.normal(k4, (E, 1, C), jnp.float32) * 0.01,
    }


def reference_forward(x, t, params):
    """Pure-JAX reference: per-member MLP applied to shared (x, t), stacked on E."""
    x_cat = jnp.concatenate([x, t], axis=-1)                   # (B, Din)
    h = jnp.maximum(
        jnp.einsum("bd,edh->ebh", x_cat, params["w1"]) + params["b1"], 0.0
    )
    return jnp.einsum("ebh,ehc->ebc", h, params["w2"]) + params["b2"]


if __name__ == "__main__":
    # Small shapes consistent with the module: ensemble E, batch B, feature dims.
    # E*H = 128, so the fused hidden activation is exactly one (8,128) vreg tile.
    E, B, D_x, D_t, H, C = 4, 8, 8, 4, 32, 8

    key = jax.random.PRNGKey(0)
    kx, kt, kp = jax.random.split(key, 3)
    x = jax.random.normal(kx, (B, D_x), jnp.float32)
    t = jax.random.normal(kt, (B, D_t), jnp.float32)
    params = init_ensemble_params(kp, E, D_x, D_t, H, C)

    # One-time packing (hoisted out of the forward path).
    packed = pack_ensemble_params(params, D_x)
    packed = {k: jax.block_until_ready(v) for k, v in packed.items()}

    out, aux = diffusion_ensemble_forward(x, t, packed)
    out = jax.block_until_ready(out)

    ref = jax.block_until_ready(reference_forward(x, t, params))
    assert out.shape == (E, B, C), out.shape
    assert aux is None
    np.testing.assert_allclose(np.asarray(out), np.asarray(ref), rtol=1e-5, atol=1e-5)

    print("KERNEL_OK")
</pallas_src>

<mosaic_0001>
module attributes {stable_mosaic.version = 11 : i64} {
  func.func @fused_ensemble_kernel(%arg0: memref<8x8xf32, #tpu.memory_space<vmem>>, %arg1: memref<8x4xf32, #tpu.memory_space<vmem>>, %arg2: memref<8x128xf32, #tpu.memory_space<vmem>>, %arg3: memref<4x128xf32, #tpu.memory_space<vmem>>, %arg4: memref<1x128xf32, #tpu.memory_space<vmem>>, %arg5: memref<4x32x8xf32, #tpu.memory_space<vmem>>, %arg6: memref<4x1x8xf32, #tpu.memory_space<vmem>>, %arg7: memref<4x8x8xf32, #tpu.memory_space<vmem>>) attributes {dimension_semantics = [], scalar_prefetch = 0 : i64, scratch_operands = 0 : i64, tpu.core_type = #tpu.core_type<tc>} {
    %c0 = arith.constant 0 : index
    %c0_0 = arith.constant 0 : index
    %0 = vector.load %arg0[%c0, %c0_0] : memref<8x8xf32, #tpu.memory_space<vmem>>, vector<8x8xf32>
    %c0_1 = arith.constant 0 : index
    %c0_2 = arith.constant 0 : index
    %1 = vector.load %arg2[%c0_1, %c0_2] : memref<8x128xf32, #tpu.memory_space<vmem>>, vector<8x128xf32>
    %cst = arith.constant dense<0.000000e+00> : vector<8x128xf32>
    %2 = tpu.matmul %0, %1, %cst {dimension_numbers = #tpu.dot_dimension_numbers<[1], [0], [0], [1], [0, 0, 1, 1], [], []>} : vector<8x8xf32>, vector<8x128xf32>, vector<8x128xf32> -> vector<8x128xf32>
    %c0_3 = arith.constant 0 : index
    %c0_4 = arith.constant 0 : index
    %3 = vector.load %arg1[%c0_3, %c0_4] : memref<8x4xf32, #tpu.memory_space<vmem>>, vector<8x4xf32>
    %c0_5 = arith.constant 0 : index
    %c0_6 = arith.constant 0 : index
    %4 = vector.load %arg3[%c0_5, %c0_6] : memref<4x128xf32, #tpu.memory_space<vmem>>, vector<4x128xf32>
    %cst_7 = arith.constant dense<0.000000e+00> : vector<8x128xf32>
    %5 = tpu.matmul %3, %4, %cst_7 {dimension_numbers = #tpu.dot_dimension_numbers<[1], [0], [0], [1], [0, 0, 1, 1], [], []>} : vector<8x4xf32>, vector<4x128xf32>, vector<8x128xf32> -> vector<8x128xf32>
    %6 = arith.addf %2, %5 : vector<8x128xf32>
    %c0_8 = arith.constant 0 : index
    %c0_9 = arith.constant 0 : index
    %7 = vector.load %arg4[%c0_8, %c0_9] : memref<1x128xf32, #tpu.memory_space<vmem>>, vector<1x128xf32>
    %8 = vector.broadcast %7 : vector<1x128xf32> to vector<8x128xf32>
    %9 = arith.addf %6, %8 : vector<8x128xf32>
    %cst_10 = arith.constant 0.000000e+00 : f32
    %10 = vector.broadcast %cst_10 : f32 to vector<8x128xf32>
    %11 = arith.maximumf %9, %10 : vector<8x128xf32>
    %12 = vector.extract_strided_slice %11 {offsets = [0, 0], sizes = [8, 32], strides = [1, 1]} : vector<8x128xf32> to vector<8x32xf32>
    %c0_11 = arith.constant 0 : index
    %c0_12 = arith.constant 0 : index
    %c0_13 = arith.constant 0 : index
    %13 = vector.load %arg5[%c0_11, %c0_12, %c0_13] : memref<4x32x8xf32, #tpu.memory_space<vmem>>, vector<1x32x8xf32>
    %14 = vector.shape_cast %13 : vector<1x32x8xf32> to vector<32x8xf32>
    %cst_14 = arith.constant dense<0.000000e+00> : vector<8x8xf32>
    %15 = tpu.matmul %12, %14, %cst_14 {dimension_numbers = #tpu.dot_dimension_numbers<[1], [0], [0], [1], [0, 0, 1, 1], [], []>} : vector<8x32xf32>, vector<32x8xf32>, vector<8x8xf32> -> vector<8x8xf32>
    %c0_15 = arith.constant 0 : index
    %c0_16 = arith.constant 0 : index
    %c0_17 = arith.constant 0 : index
    %16 = vector.load %arg6[%c0_15, %c0_16, %c0_17] : memref<4x1x8xf32, #tpu.memory_space<vmem>>, vector<1x1x8xf32>
    %17 = vector.shape_cast %16 : vector<1x1x8xf32> to vector<1x8xf32>
    %18 = vector.broadcast %17 : vector<1x8xf32> to vector<8x8xf32>
    %19 = arith.addf %15, %18 : vector<8x8xf32>
    %c0_18 = arith.constant 0 : index
    %c0_19 = arith.constant 0 : index
    %c0_20 = arith.constant 0 : index
    %20 = vector.load %arg7[%c0_18, %c0_19, %c0_20] : memref<4x8x8xf32, #tpu.memory_space<vmem>>, vector<1x8x8xf32>
    %21 = vector.shape_cast %20 : vector<1x8x8xf32> to vector<8x8xf32>
    %22 = vector.shape_cast %19 : vector<8x8xf32> to vector<1x8x8xf32>
    tpu.vector_store %arg7[%c0_18, %c0_19, %c0_20], %22 {strides = array<i32>} : memref<4x8x8xf32, #tpu.memory_space<vmem>>, vector<1x8x8xf32>,
    %23 = vector.extract_strided_slice %11 {offsets = [0, 32], sizes = [8, 32], strides = [1, 1]} : vector<8x128xf32> to vector<8x32xf32>
    %c1 = arith.constant 1 : index
    %c0_21 = arith.constant 0 : index
    %c0_22 = arith.constant 0 : index
    %24 = vector.load %arg5[%c1, %c0_21, %c0_22] : memref<4x32x8xf32, #tpu.memory_space<vmem>>, vector<1x32x8xf32>
    %25 = vector.shape_cast %24 : vector<1x32x8xf32> to vector<32x8xf32>
    %cst_23 = arith.constant dense<0.000000e+00> : vector<8x8xf32>
    %26 = tpu.matmul %23, %25, %cst_23 {dimension_numbers = #tpu.dot_dimension_numbers<[1], [0], [0], [1], [0, 0, 1, 1], [], []>} : vector<8x32xf32>, vector<32x8xf32>, vector<8x8xf32> -> vector<8x8xf32>
    %c1_24 = arith.constant 1 : index
    %c0_25 = arith.constant 0 : index
    %c0_26 = arith.constant 0 : index
    %27 = vector.load %arg6[%c1_24, %c0_25, %c0_26] : memref<4x1x8xf32, #tpu.memory_space<vmem>>, vector<1x1x8xf32>
    %28 = vector.shape_cast %27 : vector<1x1x8xf32> to vector<1x8xf32>
    %29 = vector.broadcast %28 : vector<1x8xf32> to vector<8x8xf32>
    %30 = arith.addf %26, %29 : vector<8x8xf32>
    %c1_27 = arith.constant 1 : index
    %c0_28 = arith.constant 0 : index
    %c0_29 = arith.constant 0 : index
    %31 = vector.load %arg7[%c1_27, %c0_28, %c0_29] : memref<4x8x8xf32, #tpu.memory_space<vmem>>, vector<1x8x8xf32>
    %32 = vector.shape_cast %31 : vector<1x8x8xf32> to vector<8x8xf32>
    %33 = vector.shape_cast %30 : vector<8x8xf32> to vector<1x8x8xf32>
    tpu.vector_store %arg7[%c1_27, %c0_28, %c0_29], %33 {strides = array<i32>} : memref<4x8x8xf32, #tpu.memory_space<vmem>>, vector<1x8x8xf32>,
    %34 = vector.extract_strided_slice %11 {offsets = [0, 64], sizes = [8, 32], strides = [1, 1]} : vector<8x128xf32> to vector<8x32xf32>
    %c2 = arith.constant 2 : index
    %c0_30 = arith.constant 0 : index
    %c0_31 = arith.constant 0 : index
    %35 = vector.load %arg5[%c2, %c0_30, %c0_31] : memref<4x32x8xf32, #tpu.memory_space<vmem>>, vector<1x32x8xf32>
    %36 = vector.shape_cast %35 : vector<1x32x8xf32> to vector<32x8xf32>
    %cst_32 = arith.constant dense<0.000000e+00> : vector<8x8xf32>
    %37 = tpu.matmul %34, %36, %cst_32 {dimension_numbers = #tpu.dot_dimension_numbers<[1], [0], [0], [1], [0, 0, 1, 1], [], []>} : vector<8x32xf32>, vector<32x8xf32>, vector<8x8xf32> -> vector<8x8xf32>
    %c2_33 = arith.constant 2 : index
    %c0_34 = arith.constant 0 : index
    %c0_35 = arith.constant 0 : index
    %38 = vector.load %arg6[%c2_33, %c0_34, %c0_35] : memref<4x1x8xf32, #tpu.memory_space<vmem>>, vector<1x1x8xf32>
    %39 = vector.shape_cast %38 : vector<1x1x8xf32> to vector<1x8xf32>
    %40 = vector.broadcast %39 : vector<1x8xf32> to vector<8x8xf32>
    %41 = arith.addf %37, %40 : vector<8x8xf32>
    %c2_36 = arith.constant 2 : index
    %c0_37 = arith.constant 0 : index
    %c0_38 = arith.constant 0 : index
    %42 = vector.load %arg7[%c2_36, %c0_37, %c0_38] : memref<4x8x8xf32, #tpu.memory_space<vmem>>, vector<1x8x8xf32>
    %43 = vector.shape_cast %42 : vector<1x8x8xf32> to vector<8x8xf32>
    %44 = vector.shape_cast %41 : vector<8x8xf32> to vector<1x8x8xf32>
    tpu.vector_store %arg7[%c2_36, %c0_37, %c0_38], %44 {strides = array<i32>} : memref<4x8x8xf32, #tpu.memory_space<vmem>>, vector<1x8x8xf32>,
    %45 = vector.extract_strided_slice %11 {offsets = [0, 96], sizes = [8, 32], strides = [1, 1]} : vector<8x128xf32> to vector<8x32xf32>
    %c3 = arith.constant 3 : index
    %c0_39 = arith.constant 0 : index
    %c0_40 = arith.constant 0 : index
    %46 = vector.load %arg5[%c3, %c0_39, %c0_40] : memref<4x32x8xf32, #tpu.memory_space<vmem>>, vector<1x32x8xf32>
    %47 = vector.shape_cast %46 : vector<1x32x8xf32> to vector<32x8xf32>
    %cst_41 = arith.constant dense<0.000000e+00> : vector<8x8xf32>
    %48 = tpu.matmul %45, %47, %cst_41 {dimension_numbers = #tpu.dot_dimension_numbers<[1], [0], [0], [1], [0, 0, 1, 1], [], []>} : vector<8x32xf32>, vector<32x8xf32>, vector<8x8xf32> -> vector<8x8xf32>
    %c3_42 = arith.constant 3 : index
    %c0_43 = arith.constant 0 : index
    %c0_44 = arith.constant 0 : index
    %49 = vector.load %arg6[%c3_42, %c0_43, %c0_44] : memref<4x1x8xf32, #tpu.memory_space<vmem>>, vector<1x1x8xf32>
    %50 = vector.shape_cast %49 : vector<1x1x8xf32> to vector<1x8xf32>
    %51 = vector.broadcast %50 : vector<1x8xf32> to vector<8x8xf32>
    %52 = arith.addf %48, %51 : vector<8x8xf32>
    %c3_45 = arith.constant 3 : index
    %c0_46 = arith.constant 0 : index
    %c0_47 = arith.constant 0 : index
    %53 = vector.load %arg7[%c3_45, %c0_46, %c0_47] : memref<4x8x8xf32, #tpu.memory_space<vmem>>, vector<1x8x8xf32>
    %54 = vector.shape_cast %53 : vector<1x8x8xf32> to vector<8x8xf32>
    %55 = vector.shape_cast %52 : vector<8x8xf32> to vector<1x8x8xf32>
    tpu.vector_store %arg7[%c3_45, %c0_46, %c0_47], %55 {strides = array<i32>} : memref<4x8x8xf32, #tpu.memory_space<vmem>>, vector<1x8x8xf32>,
    return
  }
}

</mosaic_0001>

<bundles_post_ra>
// kernel: diffusion_ensemble_forward.1
= control target key start
LH: loop header
LB: loop body
LE: loop exit
PB: predicated region body
PF: predicated region fallthrough
CT: control target
= control target key end

     0   :  { %vm35_vm0 = vcmask 1043456   ;;  %v696_v2 = vmov 0.0   ;;  %vm31_vm1 = vcmask 31744   ;;  %vm109_vm2 = vcmask 64512   ;;  %s861_s0 = inlined_call_operand.vmem [shape: f32[8,8], index: 0, kind: input, shape index: {}]   ;;  %s862_s1 = inlined_call_operand.vmem [shape: f32[8,4], index: 1, kind: input, shape index: {}]   ;;  %s863_s2 = inlined_call_operand.vmem [shape: f32[8,128], index: 2, kind: input, shape index: {}]   ;;  %s864_s3 = inlined_call_operand.vmem [shape: f32[4,128], index: 3, kind: input, shape index: {}]   ;;  %s865_s4 = inlined_call_operand.vmem [shape: f32[1,128], index: 4, kind: input, shape index: {}]   ;;  %s866_s5 = inlined_call_operand.vmem [shape: f32[4,32,8], index: 5, kind: input, shape index: {}]   ;;  %s867_s6 = inlined_call_operand.vmem [shape: f32[4,1,8], index: 6, kind: input, shape index: {}]   ;;  %s868_s7 = inlined_call_operand.hbm [shape: f32[4,8,8], index: 7, kind: output, shape index: {}]  }
   0x1   :  { %v30_v0 = vld [vmem:[%s864_s3] sm:$0xf]  ;;  %612 = vmatprep.subr.mxu0 %v696_v2  ;;  %617 = vmatprep.subr.mxu1 %v696_v2 }
   0x2   :  { %v28_v1 = vld [vmem:[%s863_s2] sm:$0xff] }
   0x3   :  { %v29_v3 = vld [vmem:[%s862_s1] sm:$0xff] }
   0x4   :  { %v27_v4 = vld [vmem:[%s861_s0] sm:$0xff] }
   0x5   :  { %12 = vsyncpa [#allocation3], 0  ;;  %613 = vmatpush3.msk.msra.mxu0 %vm35_vm0, %v30_v0  ;;  %vm697_vm3 = vmmov 0   ;;  %618 = vmatpush3.msra.mxu1 %v28_v1  ;;  %v195_v5 = vld [vmem:[%s866_s5 + $0x18] sm:$0xff]  ;;  %v194_v6 = vld [vmem:[%s866_s5 + $0x10] sm:$0xff]  ;;  %vm203_vm4 = vcmask 261120  }
   0x6   :  { %614 = vmatprep.mubr.msk.f32.mxu0 %vm697_vm3, %v696_v2  ;;  %619 = vmatprep.mubr.msk.f32.mxu1 %vm697_vm3, %v696_v2  ;;  %v193_v7 = vld [vmem:[%s866_s5 + $0x8] sm:$0xff]  ;;  %v192_v8 = vld [vmem:[%s866_s5] sm:$0xff]  ;;  %v570_v9 = vld [vmem:[%s866_s5 + $0x38] sm:$0xff]  ;;  %s698_s25 = smov 32   ;;  %s699_s26 = smov 96  }
   0x7   :  { %615 = vmatmul.mubr.msk.f32.vlgmr.msra.gmra.mxu0 %vm31_vm1, %v29_v3  ;;  %620 = vmatmul.mubr.msk.f32.vlgmr.msra.gmra.mxu1 %vm109_vm2, %v27_v4  ;;  %v569_v10 = vld [vmem:[%s866_s5 + $0x30] sm:$0xff]  ;;  %v568_v11 = vld [vmem:[%s866_s5 + $0x28] sm:$0xff]  ;;  %v567_v12 = vld [vmem:[%s866_s5 + $0x20] sm:$0xff]  ;;  %s700_s30 = smov 64   ;;  %s701_s19 = smov [#allocation2]  }
   0x8   :  { %622 = vmatprep.subr.mxu0 %v696_v2  ;;  %630 = vmatprep.mubr.msk.f32.mxu0 %vm697_vm3, %v696_v2  ;;  %v564_v15 = vld [vmem:[%s865_s4] ss:$0 sm:$0xff]  ;;  %v577_v21 = vld [vmem:[%s866_s5 + $0x58] sm:$0xff]  ;;  %v576_v22 = vld [vmem:[%s866_s5 + $0x50] sm:$0xff]  ;;  %s550_s20 = sshll.u32 %s701_s19, 4  ;;  %s551_s20 = int_to_ptr.vmem [resolvable:$true] %s550_s20 }
   0x9   :  { %633 = vmatprep.subr.mxu1 %v696_v2  ;;  %641 = vmatprep.mubr.msk.f32.mxu1 %vm697_vm3, %v696_v2  ;;  %v575_v23 = vld [vmem:[%s866_s5 + $0x48] sm:$0xff]  ;;  %v574_v24 = vld [vmem:[%s866_s5 + $0x40] sm:$0xff]  ;;  %v584_v25 = vld [vmem:[%s866_s5 + $0x78] sm:$0xff]  ;;  %s674_s23 = scalar_lea.vmem %s551_s20, 512  ;;  %p679_p1 = scmp.lt.s32.totalorder %s551_s20, %s551_s20 }
   0xa   :  { %623 = vmatpush3.msra.mxu0 %v195_v5  ;;  %634 = vmatpush3.msra.mxu1 %v570_v9  ;;  %v583_v27 = vld [vmem:[%s866_s5 + $0x70] sm:$0xff]  ;;  %v582_v28 = vld [vmem:[%s866_s5 + $0x68] sm:$0xff]  ;;  %v581_v30 = vld [vmem:[%s866_s5 + $0x60] sm:$0xff]  ;;  %p675_p0 = scmp.ne.s32.totalorder %s551_s20, %s674_s23  ;;  %p680_p2 = scmp.lt.s32.totalorder %s674_s23, %s674_s23 }
   0xb   :  { %624 = vmatprep.subr.mxu0 %v696_v2  ;;  %635 = vmatprep.subr.mxu1 %v696_v2  ;;  %v565_v32 = vld [vmem:[%s867_s6] ss:$0 sm:$0xff]  ;;  %v572_v36 = vld [vmem:[%s867_s6 + $0x1] ss:$0 sm:$0xff]  ;;  %v579_v40 = vld [vmem:[%s867_s6 + $0x2] ss:$0 sm:$0xff] }
   0xc   :  { %625 = vmatpush3.msra.mxu0 %v194_v6  ;;  %636 = vmatpush3.msra.mxu1 %v569_v10  ;;  %v586_v44 = vld [vmem:[%s867_s6 + $0x3] ss:$0 sm:$0xff]  ;;  %p681_p3 = por %p680_p2, %p679_p1 }
   0xd   :  { %626 = vmatprep.subr.mxu0 %v696_v2  ;;  %637 = vmatprep.subr.mxu1 %v696_v2 }
   0xe   :  { %627 = vmatpush3.msra.mxu0 %v193_v7  ;;  %638 = vmatpush3.msra.mxu1 %v568_v11  ;;  %p682_p4 = pnand %p681_p3, %p675_p0 }
   0xf   :  { %628 = vmatprep.subr.mxu0 %v696_v2  ;;  %639 = vmatprep.subr.mxu1 %v696_v2 }
  0x10   :  { %629 = vmatpush3.msra.mxu0 %v192_v8  ;;  %640 = vmatpush3.msra.mxu1 %v567_v12 }
  0x11   :  { %644 = vmatprep.subr.mxu0 %v696_v2  ;;  %655 = vmatprep.subr.mxu1 %v696_v2 }
  0xc7   :  { %v105_v13 = vpop.f32.mrf.mxu0  ;;  %v179_v14 = vpop.f32.mrf.mxu1 }
  0xc8   :  { %v180_v16 = vadd.f32 %v179_v14, %v105_v13 }
  0xc9   :  { %v616_v17 = vpop.f32.mrf.mxu0  ;;  %v621_v18 = vpop.f32.mrf.mxu1 }
  0xca   :  { %v190_v19 = vadd.f32 %v564_v15, %v180_v16 }
  0xcc   :  { %v191_v20 = vmax.f32 %v190_v19, 0.0 }
  0xce   :  { %469 = vrot.lane.b32.xlu1 %v191_v20, %s698_s25  ;;  %291 = vrot.lane.b32.xlu0 %v191_v20, %s699_s26 }
  0xcf   :  { %631 = vmatmul.mubr.msk.f32.vlgmr.msra.gmra.mxu0 %vm203_vm4, %v191_v20 }
  0xd0   :  { %645 = vmatpush3.msra.mxu0 %v577_v21  ;;  %652 = vmatprep.mubr.msk.f32.mxu0 %vm697_vm3, %v696_v2 }
  0xd1   :  { %646 = vmatprep.subr.mxu0 %v696_v2 }
  0xd2   :  { %380 = vrot.lane.b32.xlu0 %v191_v20, %s700_s30  ;;  %647 = vmatpush3.msra.mxu0 %v576_v22 }
  0xd3   :  { %648 = vmatprep.subr.mxu0 %v696_v2 }
  0xd4   :  { %649 = vmatpush3.msra.mxu0 %v575_v23 }
  0xd5   :  { %650 = vmatprep.subr.mxu0 %v696_v2 }
  0xd6   :  { %651 = vmatpush3.msra.mxu0 %v574_v24 }
 0x140   :  { %v292_v26 = vpop.permute.xlu0 %291  ;;  %v470_v31 = vpop.permute.xlu1 %469 }
 0x141   :  { %642 = vmatmul.mubr.msk.f32.vlgmr.msra.gmra.mxu1 %vm203_vm4, %v292_v26 }
 0x142   :  { %656 = vmatpush3.msra.mxu1 %v584_v25  ;;  %663 = vmatprep.mubr.msk.f32.mxu1 %vm697_vm3, %v696_v2 }
 0x143   :  { %657 = vmatprep.subr.mxu1 %v696_v2 }
 0x144   :  { %658 = vmatpush3.msra.mxu1 %v583_v27  ;;  %v381_v29 = vpop.permute.xlu0 %380 }
 0x145   :  { %659 = vmatprep.subr.mxu1 %v696_v2  ;;  %653 = vmatmul.mubr.msk.f32.vlgmr.msra.gmra.mxu0 %vm203_vm4, %v381_v29 }
 0x146   :  { %660 = vmatpush3.msra.mxu1 %v582_v28 }
 0x147   :  { %661 = vmatprep.subr.mxu1 %v696_v2 }
 0x148   :  { %662 = vmatpush3.msra.mxu1 %v581_v30 }
 0x149   :  { %664 = vmatmul.mubr.msk.f32.vlgmr.msra.gmra.mxu1 %vm203_vm4, %v470_v31 }
 0x18f   :  { %v273_v33 = vpop.f32.mrf.mxu0 }
 0x190   :  { %v274_v34 = vadd.f32 %v565_v32, %v273_v33 }
 0x191   :  { %v632_v35 = vpop.f32.mrf.mxu0 }
 0x192   :  { %277 = vst.msk [vmem:[#allocation2] sm:$0xff] %vm109_vm2, %v274_v34 }
 0x201   :  { %v361_v37 = vpop.f32.mrf.mxu1 }
 0x202   :  { %v362_v38 = vadd.f32 %v572_v36, %v361_v37 }
 0x203   :  { %v643_v39 = vpop.f32.mrf.mxu1 }
 0x204   :  { %366 = vst.msk [vmem:[#allocation2 + $0x8] sm:$0xff] %vm109_vm2, %v362_v38 }
 0x205   :  { %v450_v41 = vpop.f32.mrf.mxu0 }
 0x206   :  { %v451_v42 = vadd.f32 %v579_v40, %v450_v41 }
 0x207   :  { %v654_v43 = vpop.f32.mrf.mxu0 }
 0x208   :  { %455 = vst.msk [vmem:[#allocation2 + $0x10] sm:$0xff] %vm109_vm2, %v451_v42 }
 0x209   :  { %v539_v45 = vpop.f32.mrf.mxu1 }
 0x20a   :  { %v540_v46 = vadd.f32 %v586_v44, %v539_v45 }
 0x20b   :  { %v665_v47 = vpop.f32.mrf.mxu1 }
 0x20c   :  { %544 = vst.msk [vmem:[#allocation2 + $0x18] sm:$0xff] %vm109_vm2, %v540_v46 }
 0x20d   :  { %685 = shalt.err (!%p682_p4)
}
 0x20e   :  { %s702_s24 = smov 128   ;;  %s703_s25 = smov 8  }
 0x20f   :  { %556 = dma.vmem_to_hbm [thread:$0]  %s551_s20, 512, %s868_s7, [#allocation3], %s702_s24, %s702_s24, %s703_s25  }
 0x210   :  { %694 = dma.done.wait [#allocation3], 512  }
 0x211   :  { %695 = vsyncadd [#allocation3], 4294966784 }
 0x212   :  { %560 = vsyncpa [#allocation3], 1 }

</bundles_post_ra>
